<compile_context>
chip_gen: v7x
topology: tpu7x:2x2x1
jax: 0.10.0
libtpu: 0.0.40
codegen_flags: <defaults>
</compile_context>

<pallas_src>
import functools

import jax
import jax.numpy as jnp
from jax.experimental import pallas as pl
from jax.experimental.pallas import tpu as pltpu


# --------------------------------------------------------------------------------------
# Kernel
# --------------------------------------------------------------------------------------
def vae_kernel(x_ref, eps_ref,
               w_enc_ref, b_enc_ref,
               w_mulv_ref, b_mulv_ref,
               w_dec1_ref, b_dec1_ref,
               w_dec2_ref, b_dec2_ref,
               dec_ref, mu_ref, lv_ref):
    md = w_enc_ref.dtype                     # matmul input dtype (bf16 by default)
    L = mu_ref.shape[1]                      # latent dim

    # ---- encoder: ReLU(x @ W_enc + b_enc) -> (TB, H), f32 elementwise ----
    x = x_ref[...].astype(md)
    h = jnp.dot(x, w_enc_ref[...], preferred_element_type=jnp.float32) + b_enc_ref[...]
    h = jnp.maximum(h, 0.0)

    # ---- fused (and lane-padded) mu|log_var projection -> (TB, 128) ----
    mulv = jnp.dot(h.astype(md), w_mulv_ref[...],
                   preferred_element_type=jnp.float32) + b_mulv_ref[...]
    mu = mulv[:, :L]
    log_var = mulv[:, L:2 * L]
    mu_ref[...] = mu
    lv_ref[...] = log_var

    # ---- reparameterize: z = mu + eps * exp(0.5 * log_var) (f32, EUP exp) ----
    std = jnp.exp(0.5 * log_var)
    z = mu + eps_ref[...] * std

    # ---- decoder: sigmoid(ReLU(z @ W_d1 + b_d1) @ W_d2 + b_d2) -> (TB, D) ----
    h2 = jnp.dot(z.astype(md), w_dec1_ref[...],
                 preferred_element_type=jnp.float32) + b_dec1_ref[...]
    h2 = jnp.maximum(h2, 0.0)
    logits = jnp.dot(h2.astype(md), w_dec2_ref[...],
                     preferred_element_type=jnp.float32) + b_dec2_ref[...]
    dec_ref[...] = jax.nn.sigmoid(logits)


# --------------------------------------------------------------------------------------
# Wrapper
# --------------------------------------------------------------------------------------
def _round_up(n, m):
    return ((n + m - 1) // m) * m


def _choose_batch_tile(B):
    """Large tiles (amortize ~0.35us/step) but keep >=2 grid steps for v7x megacore."""
    B8 = _round_up(max(B, 8), 8)
    if B8 <= 128:
        return B8                                   # single tiny step
    for tb in (512, 256, 128):
        if _round_up(B8, tb) // tb >= 2:
            return tb
    return 128


def prepare_params(params, matmul_dtype=jnp.bfloat16):
    """One-time parameter prep (concat / pad / reshape / cast). Call outside the hot path.

    `params` follows the PyTorch module, with weights stored as (in, out):
      (w_enc, b_enc, w_mu, b_mu, w_lv, b_lv, w_dec1, b_dec1, w_dec2, b_dec2)
    """
    (w_enc, b_enc, w_mu, b_mu, w_lv, b_lv, w_dec1, b_dec1, w_dec2, b_dec2) = params
    D, H = w_enc.shape
    L = w_mu.shape[1]
    N = max(128, _round_up(2 * L, 128))             # lane-dense fused mu|lv width

    w_mulv = jnp.zeros((H, N), jnp.float32)
    w_mulv = w_mulv.at[:, :L].set(w_mu).at[:, L:2 * L].set(w_lv)
    b_mulv = jnp.zeros((1, N), jnp.float32)
    b_mulv = b_mulv.at[0, :L].set(b_mu).at[0, L:2 * L].set(b_lv)

    md = matmul_dtype
    return dict(
        w_enc=w_enc.astype(md),
        b_enc=b_enc.reshape(1, H).astype(jnp.float32),
        w_mulv=w_mulv.astype(md),
        b_mulv=b_mulv,
        w_dec1=w_dec1.astype(md),
        b_dec1=b_dec1.reshape(1, H).astype(jnp.float32),
        w_dec2=w_dec2.astype(md),
        b_dec2=b_dec2.reshape(1, D).astype(jnp.float32),
    )


def predictor_vae_forward(x, eps, prep, *, batch_tile=None):
    """Fused VAE forward. Returns (decoded, mu, log_var). `prep` from prepare_params()."""
    B, D = x.shape
    H = prep["w_enc"].shape[1]
    N = prep["w_mulv"].shape[1]
    L = eps.shape[1]

    TB = _choose_batch_tile(B) if batch_tile is None else batch_tile
    B_pad = _round_up(B, TB)
    if B_pad != B:                                   # keep VMEM bounded, grid pipelined
        x = jnp.pad(x, ((0, B_pad - B), (0, 0)))
        eps = jnp.pad(eps, ((0, B_pad - B), (0, 0)))
    grid = (B_pad // TB,)

    row_map = lambda i: (i, 0)                       # batch-tiled operands
    res_map = lambda i: (0, 0)                       # resident weights / biases

    grid_spec = pltpu.PrefetchScalarGridSpec(
        num_scalar_prefetch=0,
        grid=grid,
        in_specs=[
            pl.BlockSpec((TB, D), row_map),          # x
            pl.BlockSpec((TB, L), row_map),          # eps
            pl.BlockSpec((D, H), res_map),           # W_enc
            pl.BlockSpec((1, H), res_map),           # b_enc
            pl.BlockSpec((H, N), res_map),           # W_mu|W_lv (lane-padded)
            pl.BlockSpec((1, N), res_map),           # b_mu|b_lv (lane-padded)
            pl.BlockSpec((L, H), res_map),           # W_dec1
            pl.BlockSpec((1, H), res_map),           # b_dec1
            pl.BlockSpec((H, D), res_map),           # W_dec2
            pl.BlockSpec((1, D), res_map),           # b_dec2
        ],
        out_specs=[
            pl.BlockSpec((TB, D), row_map),          # decoded
            pl.BlockSpec((TB, L), row_map),          # mu
            pl.BlockSpec((TB, L), row_map),          # log_var
        ],
    )

    weight_bytes = sum(int(prep[k].size) * prep[k].dtype.itemsize for k in prep)
    cost = pl.CostEstimate(
        flops=2 * B_pad * (D * H + H * N + L * H + H * D),
        transcendentals=B_pad * (L + D),             # exp + sigmoid
        bytes_accessed=4 * B_pad * (2 * D + 3 * L) + weight_bytes,
    )

    decoded, mu, log_var = pl.pallas_call(
        vae_kernel,
        out_shape=(jax.ShapeDtypeStruct((B_pad, D), jnp.float32),
                   jax.ShapeDtypeStruct((B_pad, L), jnp.float32),
                   jax.ShapeDtypeStruct((B_pad, L), jnp.float32)),
        grid_spec=grid_spec,
        compiler_params=pltpu.CompilerParams(
            dimension_semantics=("parallel",)),
        cost_estimate=cost,
    )(x, eps,
      prep["w_enc"], prep["b_enc"],
      prep["w_mulv"], prep["b_mulv"],
      prep["w_dec1"], prep["b_dec1"],
      prep["w_dec2"], prep["b_dec2"])

    if B_pad != B:
        decoded, mu, log_var = decoded[:B], mu[:B], log_var[:B]
    return decoded, mu, log_var


# --------------------------------------------------------------------------------------
# Pure-JAX reference & param init
# --------------------------------------------------------------------------------------
def predictor_vae_reference(x, eps, params, matmul_dtype=None):
    """Reference matching the PyTorch forward (same eps). Optionally mimics bf16 matmuls."""
    (w_enc, b_enc, w_mu, b_mu, w_lv, b_lv, w_dec1, b_dec1, w_dec2, b_dec2) = params

    def mm(a, w):
        if matmul_dtype is not None:
            a = a.astype(matmul_dtype)
            w = w.astype(matmul_dtype)
        return jnp.dot(a, w, preferred_element_type=jnp.float32)

    h = jax.nn.relu(mm(x, w_enc) + b_enc)
    mu = mm(h, w_mu) + b_mu
    log_var = mm(h, w_lv) + b_lv
    z = mu + eps * jnp.exp(0.5 * log_var)
    h2 = jax.nn.relu(mm(z, w_dec1) + b_dec1)
    decoded = jax.nn.sigmoid(mm(h2, w_dec2) + b_dec2)
    return decoded, mu, log_var


def init_params(key, *, input_dim, hidden_dim, latent_dim):
    """Deterministic synthetic parameters (shapes from predictor_vae.__init__).

    Weights are stored pre-transposed vs PyTorch's (out, in) convention, i.e. (in, out).
    """
    ks = jax.random.split(key, 10)

    def u(k, shape, fan_in):
        bound = 1.0 / jnp.sqrt(jnp.float32(fan_in))
        return jax.random.uniform(k, shape, jnp.float32, -bound, bound)

    w_enc = u(ks[0], (input_dim, hidden_dim), input_dim)     # encoder Linear
    b_enc = u(ks[1], (hidden_dim,), input_dim)
    w_mu = u(ks[2], (hidden_dim, latent_dim), hidden_dim)    # encoder_mu
    b_mu = u(ks[3], (latent_dim,), hidden_dim)
    w_lv = u(ks[4], (hidden_dim, latent_dim), hidden_dim)    # encoder_logvar
    b_lv = u(ks[5], (latent_dim,), hidden_dim)
    w_dec1 = u(ks[6], (latent_dim, hidden_dim), latent_dim)  # decoder Linear 1
    b_dec1 = u(ks[7], (hidden_dim,), latent_dim)
    w_dec2 = u(ks[8], (hidden_dim, input_dim), hidden_dim)   # decoder Linear 2
    b_dec2 = u(ks[9], (input_dim,), hidden_dim)
    return (w_enc, b_enc, w_mu, b_mu, w_lv, b_lv, w_dec1, b_dec1, w_dec2, b_dec2)


if __name__ == "__main__":
    # Small shapes consistent with the module: batch=8, input_dim=128,
    # hidden_dim=256 (default), latent_dim=16 (default).
    B = 8
    D = 128
    H = 256
    L = 16

    key = jax.random.PRNGKey(0)
    kx, ke, kp = jax.random.split(key, 3)
    x = jax.random.uniform(kx, (B, D), jnp.float32)          # VAE-style inputs in [0, 1)
    eps = jax.random.normal(ke, (B, L), jnp.float32)         # reparameterization noise
    # TODO(synk): torch.randn_like's RNG stream is not reproducible; eps is supplied
    # externally so the forward stays deterministic and checkable.
    params = init_params(kp, input_dim=D, hidden_dim=H, latent_dim=L)

    prep = prepare_params(params, matmul_dtype=jnp.bfloat16)  # one-time prep (hot path free)

    fwd = jax.jit(functools.partial(predictor_vae_forward))
    decoded, mu, log_var = fwd(x, eps, prep)
    (decoded, mu, log_var) = jax.block_until_ready((decoded, mu, log_var))

    assert decoded.shape == (B, D)
    assert mu.shape == (B, L) and log_var.shape == (B, L)

    # Tight check against a reference using the same bf16 matmul inputs.
    d_b, mu_b, lv_b = predictor_vae_reference(x, eps, params, matmul_dtype=jnp.bfloat16)
    assert jnp.allclose(decoded, d_b, atol=2e-3, rtol=2e-3)
    assert jnp.allclose(mu, mu_b, atol=2e-3, rtol=2e-3)
    assert jnp.allclose(log_var, lv_b, atol=2e-3, rtol=2e-3)

    # Looser sanity check against the pure-f32 reference (bf16 matmul rounding).
    d_f, mu_f, lv_f = predictor_vae_reference(x, eps, params)
    assert jnp.allclose(decoded, d_f, atol=5e-2, rtol=5e-2)
    assert jnp.allclose(mu, mu_f, atol=5e-2, rtol=5e-2)
    assert jnp.allclose(log_var, lv_f, atol=5e-2, rtol=5e-2)

    print("KERNEL_OK")
</pallas_src>

<mosaic_0001>
module attributes {stable_mosaic.version = 11 : i64} {
  func.func @vae_kernel(%arg0: i32, %arg1: memref<8x128xf32, #tpu.memory_space<vmem>>, %arg2: memref<8x16xf32, #tpu.memory_space<vmem>>, %arg3: memref<128x256xbf16, #tpu.memory_space<vmem>>, %arg4: memref<1x256xf32, #tpu.memory_space<vmem>>, %arg5: memref<256x128xbf16, #tpu.memory_space<vmem>>, %arg6: memref<1x128xf32, #tpu.memory_space<vmem>>, %arg7: memref<16x256xbf16, #tpu.memory_space<vmem>>, %arg8: memref<1x256xf32, #tpu.memory_space<vmem>>, %arg9: memref<256x128xbf16, #tpu.memory_space<vmem>>, %arg10: memref<1x128xf32, #tpu.memory_space<vmem>>, %arg11: memref<8x128xf32, #tpu.memory_space<vmem>>, %arg12: memref<8x16xf32, #tpu.memory_space<vmem>>, %arg13: memref<8x16xf32, #tpu.memory_space<vmem>>) attributes {dimension_semantics = [#tpu.dimension_semantics<parallel>], iteration_bounds = array<i64: 1>, scalar_prefetch = 0 : i64, scratch_operands = 0 : i64, tpu.core_type = #tpu.core_type<tc>, window_params = [{transform_indices = @transform_0, window_bounds = array<i64: 8, 128>}, {transform_indices = @transform_1, window_bounds = array<i64: 8, 16>}, {pipeline_mode = #tpu.pipeline_mode<synchronous>, transform_indices = @transform_2, window_bounds = array<i64: 128, 256>}, {pipeline_mode = #tpu.pipeline_mode<synchronous>, transform_indices = @transform_3, window_bounds = array<i64: 1, 256>}, {pipeline_mode = #tpu.pipeline_mode<synchronous>, transform_indices = @transform_4, window_bounds = array<i64: 256, 128>}, {pipeline_mode = #tpu.pipeline_mode<synchronous>, transform_indices = @transform_5, window_bounds = array<i64: 1, 128>}, {pipeline_mode = #tpu.pipeline_mode<synchronous>, transform_indices = @transform_6, window_bounds = array<i64: 16, 256>}, {pipeline_mode = #tpu.pipeline_mode<synchronous>, transform_indices = @transform_7, window_bounds = array<i64: 1, 256>}, {pipeline_mode = #tpu.pipeline_mode<synchronous>, transform_indices = @transform_8, window_bounds = array<i64: 256, 128>}, {pipeline_mode = #tpu.pipeline_mode<synchronous>, transform_indices = @transform_9, window_bounds = array<i64: 1, 128>}, {transform_indices = @transform_10, window_bounds = array<i64: 8, 128>}, {transform_indices = @transform_11, window_bounds = array<i64: 8, 16>}, {transform_indices = @transform_12, window_bounds = array<i64: 8, 16>}]} {
    %c0 = arith.constant 0 : index
    %c0_0 = arith.constant 0 : index
    %0 = vector.load %arg1[%c0, %c0_0] : memref<8x128xf32, #tpu.memory_space<vmem>>, vector<8x128xf32>
    %1 = arith.truncf %0 : vector<8x128xf32> to vector<8x128xbf16>
    %c0_1 = arith.constant 0 : index
    %c0_2 = arith.constant 0 : index
    %2 = vector.load %arg3[%c0_1, %c0_2] : memref<128x256xbf16, #tpu.memory_space<vmem>>, vector<128x256xbf16>
    %cst = arith.constant dense<0.000000e+00> : vector<8x256xf32>
    %3 = tpu.matmul %1, %2, %cst {dimension_numbers = #tpu.dot_dimension_numbers<[1], [0], [0], [1], [0, 0, 1, 1], [], []>} : vector<8x128xbf16>, vector<128x256xbf16>, vector<8x256xf32> -> vector<8x256xf32>
    %c0_3 = arith.constant 0 : index
    %c0_4 = arith.constant 0 : index
    %4 = vector.load %arg4[%c0_3, %c0_4] : memref<1x256xf32, #tpu.memory_space<vmem>>, vector<1x256xf32>
    %5 = vector.broadcast %4 : vector<1x256xf32> to vector<8x256xf32>
    %6 = arith.addf %3, %5 : vector<8x256xf32>
    %cst_5 = arith.constant 0.000000e+00 : f32
    %7 = vector.broadcast %cst_5 : f32 to vector<8x256xf32>
    %8 = arith.maximumf %6, %7 : vector<8x256xf32>
    %9 = arith.truncf %8 : vector<8x256xf32> to vector<8x256xbf16>
    %c0_6 = arith.constant 0 : index
    %c0_7 = arith.constant 0 : index
    %10 = vector.load %arg5[%c0_6, %c0_7] : memref<256x128xbf16, #tpu.memory_space<vmem>>, vector<256x128xbf16>
    %cst_8 = arith.constant dense<0.000000e+00> : vector<8x128xf32>
    %11 = tpu.matmul %9, %10, %cst_8 {dimension_numbers = #tpu.dot_dimension_numbers<[1], [0], [0], [1], [0, 0, 1, 1], [], []>} : vector<8x256xbf16>, vector<256x128xbf16>, vector<8x128xf32> -> vector<8x128xf32>
    %c0_9 = arith.constant 0 : index
    %c0_10 = arith.constant 0 : index
    %12 = vector.load %arg6[%c0_9, %c0_10] : memref<1x128xf32, #tpu.memory_space<vmem>>, vector<1x128xf32>
    %13 = vector.broadcast %12 : vector<1x128xf32> to vector<8x128xf32>
    %14 = arith.addf %11, %13 : vector<8x128xf32>
    %15 = vector.extract_strided_slice %14 {offsets = [0, 0], sizes = [8, 16], strides = [1, 1]} : vector<8x128xf32> to vector<8x16xf32>
    %16 = vector.extract_strided_slice %14 {offsets = [0, 16], sizes = [8, 16], strides = [1, 1]} : vector<8x128xf32> to vector<8x16xf32>
    %c0_11 = arith.constant 0 : index
    %c0_12 = arith.constant 0 : index
    %17 = vector.load %arg12[%c0_11, %c0_12] : memref<8x16xf32, #tpu.memory_space<vmem>>, vector<8x16xf32>
    tpu.vector_store %arg12[%c0_11, %c0_12], %15 {strides = array<i32>} : memref<8x16xf32, #tpu.memory_space<vmem>>, vector<8x16xf32>,
    %c0_13 = arith.constant 0 : index
    %c0_14 = arith.constant 0 : index
    %18 = vector.load %arg13[%c0_13, %c0_14] : memref<8x16xf32, #tpu.memory_space<vmem>>, vector<8x16xf32>
    tpu.vector_store %arg13[%c0_13, %c0_14], %16 {strides = array<i32>} : memref<8x16xf32, #tpu.memory_space<vmem>>, vector<8x16xf32>,
    %cst_15 = arith.constant 5.000000e-01 : f32
    %19 = vector.broadcast %cst_15 : f32 to vector<8x16xf32>
    %20 = arith.mulf %19, %16 : vector<8x16xf32>
    %21 = math.exp %20 : vector<8x16xf32>
    %c0_16 = arith.constant 0 : index
    %c0_17 = arith.constant 0 : index
    %22 = vector.load %arg2[%c0_16, %c0_17] : memref<8x16xf32, #tpu.memory_space<vmem>>, vector<8x16xf32>
    %23 = arith.mulf %22, %21 : vector<8x16xf32>
    %24 = arith.addf %15, %23 : vector<8x16xf32>
    %25 = arith.truncf %24 : vector<8x16xf32> to vector<8x16xbf16>
    %c0_18 = arith.constant 0 : index
    %c0_19 = arith.constant 0 : index
    %26 = vector.load %arg7[%c0_18, %c0_19] : memref<16x256xbf16, #tpu.memory_space<vmem>>, vector<16x256xbf16>
    %cst_20 = arith.constant dense<0.000000e+00> : vector<8x256xf32>
    %27 = tpu.matmul %25, %26, %cst_20 {dimension_numbers = #tpu.dot_dimension_numbers<[1], [0], [0], [1], [0, 0, 1, 1], [], []>} : vector<8x16xbf16>, vector<16x256xbf16>, vector<8x256xf32> -> vector<8x256xf32>
    %c0_21 = arith.constant 0 : index
    %c0_22 = arith.constant 0 : index
    %28 = vector.load %arg8[%c0_21, %c0_22] : memref<1x256xf32, #tpu.memory_space<vmem>>, vector<1x256xf32>
    %29 = vector.broadcast %28 : vector<1x256xf32> to vector<8x256xf32>
    %30 = arith.addf %27, %29 : vector<8x256xf32>
    %cst_23 = arith.constant 0.000000e+00 : f32
    %31 = vector.broadcast %cst_23 : f32 to vector<8x256xf32>
    %32 = arith.maximumf %30, %31 : vector<8x256xf32>
    %33 = arith.truncf %32 : vector<8x256xf32> to vector<8x256xbf16>
    %c0_24 = arith.constant 0 : index
    %c0_25 = arith.constant 0 : index
    %34 = vector.load %arg9[%c0_24, %c0_25] : memref<256x128xbf16, #tpu.memory_space<vmem>>, vector<256x128xbf16>
    %cst_26 = arith.constant dense<0.000000e+00> : vector<8x128xf32>
    %35 = tpu.matmul %33, %34, %cst_26 {dimension_numbers = #tpu.dot_dimension_numbers<[1], [0], [0], [1], [0, 0, 1, 1], [], []>} : vector<8x256xbf16>, vector<256x128xbf16>, vector<8x128xf32> -> vector<8x128xf32>
    %c0_27 = arith.constant 0 : index
    %c0_28 = arith.constant 0 : index
    %36 = vector.load %arg10[%c0_27, %c0_28] : memref<1x128xf32, #tpu.memory_space<vmem>>, vector<1x128xf32>
    %37 = vector.broadcast %36 : vector<1x128xf32> to vector<8x128xf32>
    %38 = arith.addf %35, %37 : vector<8x128xf32>
    %39 = arith.negf %38 : vector<8x128xf32>
    %40 = math.exp %39 : vector<8x128xf32>
    %cst_29 = arith.constant 1.000000e+00 : f32
    %41 = vector.broadcast %cst_29 : f32 to vector<8x128xf32>
    %42 = arith.addf %41, %40 : vector<8x128xf32>
    %43 = arith.divf %41, %42 : vector<8x128xf32>
    %c0_30 = arith.constant 0 : index
    %c0_31 = arith.constant 0 : index
    %44 = vector.load %arg11[%c0_30, %c0_31] : memref<8x128xf32, #tpu.memory_space<vmem>>, vector<8x128xf32>
    tpu.vector_store %arg11[%c0_30, %c0_31], %43 {strides = array<i32>} : memref<8x128xf32, #tpu.memory_space<vmem>>, vector<8x128xf32>,
    return
  }
  func.func @transform_0(%arg0: i32) -> (i32, i32) {
    %c0_i32 = arith.constant 0 : i32
    %c0_i32_0 = arith.constant 0 : i32
    return %arg0, %c0_i32 : i32, i32
  }
  func.func @transform_1(%arg0: i32) -> (i32, i32) {
    %c0_i32 = arith.constant 0 : i32
    %c0_i32_0 = arith.constant 0 : i32
    return %arg0, %c0_i32 : i32, i32
  }
  func.func @transform_2(%arg0: i32) -> (i32, i32) {
    %c0_i32 = arith.constant 0 : i32
    %c0_i32_0 = arith.constant 0 : i32
    %c0_i32_1 = arith.constant 0 : i32
    return %c0_i32, %c0_i32_0 : i32, i32
  }
  func.func @transform_3(%arg0: i32) -> (i32, i32) {
    %c0_i32 = arith.constant 0 : i32
    %c0_i32_0 = arith.constant 0 : i32
    %c0_i32_1 = arith.constant 0 : i32
    return %c0_i32, %c0_i32_0 : i32, i32
  }
  func.func @transform_4(%arg0: i32) -> (i32, i32) {
    %c0_i32 = arith.constant 0 : i32
    %c0_i32_0 = arith.constant 0 : i32
    %c0_i32_1 = arith.constant 0 : i32
    return %c0_i32, %c0_i32_0 : i32, i32
  }
  func.func @transform_5(%arg0: i32) -> (i32, i32) {
    %c0_i32 = arith.constant 0 : i32
    %c0_i32_0 = arith.constant 0 : i32
    %c0_i32_1 = arith.constant 0 : i32
    return %c0_i32, %c0_i32_0 : i32, i32
  }
  func.func @transform_6(%arg0: i32) -> (i32, i32) {
    %c0_i32 = arith.constant 0 : i32
    %c0_i32_0 = arith.constant 0 : i32
    %c0_i32_1 = arith.constant 0 : i32
    return %c0_i32, %c0_i32_0 : i32, i32
  }
  func.func @transform_7(%arg0: i32) -> (i32, i32) {
    %c0_i32 = arith.constant 0 : i32
    %c0_i32_0 = arith.constant 0 : i32
    %c0_i32_1 = arith.constant 0 : i32
    return %c0_i32, %c0_i32_0 : i32, i32
  }
  func.func @transform_8(%arg0: i32) -> (i32, i32) {
    %c0_i32 = arith.constant 0 : i32
    %c0_i32_0 = arith.constant 0 : i32
    %c0_i32_1 = arith.constant 0 : i32
    return %c0_i32, %c0_i32_0 : i32, i32
  }
  func.func @transform_9(%arg0: i32) -> (i32, i32) {
    %c0_i32 = arith.constant 0 : i32
    %c0_i32_0 = arith.constant 0 : i32
    %c0_i32_1 = arith.constant 0 : i32
    return %c0_i32, %c0_i32_0 : i32, i32
  }
  func.func @transform_10(%arg0: i32) -> (i32, i32) {
    %c0_i32 = arith.constant 0 : i32
    %c0_i32_0 = arith.constant 0 : i32
    return %arg0, %c0_i32 : i32, i32
  }
  func.func @transform_11(%arg0: i32) -> (i32, i32) {
    %c0_i32 = arith.constant 0 : i32
    %c0_i32_0 = arith.constant 0 : i32
    return %arg0, %c0_i32 : i32, i32
  }
  func.func @transform_12(%arg0: i32) -> (i32, i32) {
    %c0_i32 = arith.constant 0 : i32
    %c0_i32_0 = arith.constant 0 : i32
    return %arg0, %c0_i32 : i32, i32
  }
}

</mosaic_0001>

<bundles_post_ra>
// kernel: predictor_vae_forward.1
= control target key start
LH: loop header
LB: loop body
LE: loop exit
PB: predicated region body
PF: predicated region fallthrough
CT: control target
= control target key end

     0   :  { %18 = vsyncpa [#allocation3], 0  ;;  %s1342_s0 = inlined_call_operand.hbm [shape: f32[8,128], index: 0, kind: input, shape index: {}]   ;;  %s1343_s1 = inlined_call_operand.hbm [shape: f32[8,16], index: 1, kind: input, shape index: {}]   ;;  %s1344_s2 = inlined_call_operand.hbm [shape: bf16[128,256], index: 2, kind: input, shape index: {}]   ;;  %s1345_s3 = inlined_call_operand.vmem [shape: f32[1,256], index: 3, kind: input, shape index: {}]   ;;  %s1346_s4 = inlined_call_operand.hbm [shape: bf16[256,128], index: 4, kind: input, shape index: {}]   ;;  %s1347_s5 = inlined_call_operand.vmem [shape: f32[1,128], index: 5, kind: input, shape index: {}]   ;;  %s1348_s6 = inlined_call_operand.vmem [shape: bf16[16,256], index: 6, kind: input, shape index: {}]   ;;  %s1349_s7 = inlined_call_operand.vmem [shape: f32[1,256], index: 7, kind: input, shape index: {}]   ;;  %s1350_s8 = inlined_call_operand.hbm [shape: bf16[256,128], index: 8, kind: input, shape index: {}]   ;;  %s1351_s9 = inlined_call_operand.vmem [shape: f32[1,128], index: 9, kind: input, shape index: {}]   ;;  %s1352_s10 = inlined_call_operand.hbm [shape: f32[8,128], index: 10, kind: output, shape index: {0}]   ;;  %s1353_s11 = inlined_call_operand.hbm [shape: f32[8,16], index: 11, kind: output, shape index: {1}]   ;;  %s1354_s12 = inlined_call_operand.hbm [shape: f32[8,16], index: 12, kind: output, shape index: {2}]  }
   0x1   :  { %19 = vsyncpa [#allocation6], 0 }
   0x2   :  { %20 = vsyncpa [#allocation9], 0 }
   0x3   :  { %21 = vsyncpa [#allocation4], 0 }
   0x4   :  { %22 = vsyncpa [#allocation13], 0  ;;  %s1114_s21 = smov [#allocation5]   ;;  %s1115_s23 = smov [#allocation8]  }
   0x5   :  { %s39_s22 = sshll.u32 %s1114_s21, 4  ;;  %s62_s24 = sshll.u32 %s1115_s23, 4  ;;  %s40_s22 = int_to_ptr.vmem [resolvable:$true] %s39_s22  ;;  %s1193_s24 = int_to_ptr.vmem [resolvable:$true] %s62_s24 }
   0x6   :  { %s928_s27 = scalar_lea.hbm %s1343_s1, 128 }
   0x7   :  { %p929_p0 = scmp.ne.s32.totalorder %s1343_s1, %s928_s27  ;;  %p932_p1 = scmp.lt.u32.totalorder %s928_s27, %s1343_s1 }
   0x9   :  { %p934_p2 = pnand %p932_p1, %p929_p0 }
   0xb   :  { %937 = shalt.err (!%p934_p2)
}
   0xc   :  { %s938_s14 = scalar_lea.vmem %s40_s22, 128  ;;  %p943_p4 = scmp.lt.s32.totalorder %s40_s22, %s40_s22 }
   0xd   :  { %p939_p3 = scmp.ne.s32.totalorder %s40_s22, %s938_s14  ;;  %p944_p5 = scmp.lt.s32.totalorder %s938_s14, %s938_s14 }
   0xf   :  { %p945_p6 = por %p944_p5, %p943_p4 }
  0x11   :  { %p946_p7 = pnand %p945_p6, %p939_p3 }
  0x13   :  { %949 = shalt.err (!%p946_p7)
}
  0x14   :  { %42 = dma.hbm_to_vmem [thread:$0]  %s1343_s1, 128, %s40_s22, [#allocation6]  }
  0x15   :  { %s950_s19 = scalar_lea.hbm %s1346_s4, 2048 }
  0x16   :  { %p951_p8 = scmp.ne.s32.totalorder %s1346_s4, %s950_s19  ;;  %p954_p9 = scmp.lt.u32.totalorder %s950_s19, %s1346_s4 }
  0x18   :  { %p956_p10 = pnand %p954_p9, %p951_p8 }
  0x1a   :  { %959 = shalt.err (!%p956_p10)
}
  0x1b   :  { %s960_s26 = scalar_lea.vmem %s1193_s24, 2048  ;;  %p965_p12 = scmp.lt.s32.totalorder %s1193_s24, %s1193_s24 }
  0x1c   :  { %p961_p11 = scmp.ne.s32.totalorder %s1193_s24, %s960_s26  ;;  %p966_p13 = scmp.lt.s32.totalorder %s960_s26, %s960_s26 }
  0x1e   :  { %p967_p0 = por %p966_p13, %p965_p12 }
  0x20   :  { %p968_p1 = pnand %p967_p0, %p961_p11 }
  0x22   :  { %971 = shalt.err (!%p968_p1)
}
  0x23   :  { %s1116_s1 = smov 64   ;;  %s1117_s22 = smov 4  }
  0x24   :  { %68 = dma.hbm_to_vmem [thread:$0]  %s1346_s4, 2048, %s1193_s24, [#allocation9], %s1116_s1, %s1116_s1, %s1117_s22  }
  0x25   :  { %s1118_s29 = smov [#allocation2]   ;;  %s1119_s13 = smov [#allocation7]  }
  0x26   :  { %s29_s30 = sshll.u32 %s1118_s29, 4  ;;  %s48_s14 = sshll.u32 %s1119_s13, 4  ;;  %s30_s30 = int_to_ptr.vmem [resolvable:$true] %s29_s30  ;;  %s1227_s14 = int_to_ptr.vmem [resolvable:$true] %s48_s14 }
  0x27   :  { %s972_s17 = scalar_lea.hbm %s1342_s0, 128 }
  0x28   :  { %p973_p2 = scmp.ne.s32.totalorder %s1342_s0, %s972_s17  ;;  %p976_p3 = scmp.lt.u32.totalorder %s972_s17, %s1342_s0 }
  0x2a   :  { %p978_p4 = pnand %p976_p3, %p973_p2 }
  0x2c   :  { %981 = shalt.err (!%p978_p4)
}
  0x2d   :  { %s982_s4 = scalar_lea.vmem %s30_s30, 128  ;;  %p987_p6 = scmp.lt.s32.totalorder %s30_s30, %s30_s30 }
  0x2e   :  { %p983_p5 = scmp.ne.s32.totalorder %s30_s30, %s982_s4  ;;  %p988_p7 = scmp.lt.s32.totalorder %s982_s4, %s982_s4 }
  0x30   :  { %p989_p8 = por %p988_p7, %p987_p6 }
  0x32   :  { %p990_p9 = pnand %p989_p8, %p983_p5 }
  0x34   :  { %993 = shalt.err (!%p990_p9)
}
  0x35   :  { %32 = dma.hbm_to_vmem [thread:$0]  %s1342_s0, 128, %s30_s30, [#allocation3]  }
  0x36   :  { %s994_s27 = scalar_lea.hbm %s1344_s2, 2048 }
  0x37   :  { %p995_p10 = scmp.ne.s32.totalorder %s1344_s2, %s994_s27  ;;  %p998_p11 = scmp.lt.u32.totalorder %s994_s27, %s1344_s2 }
  0x39   :  { %p1000_p12 = pnand %p998_p11, %p995_p10 }
  0x3b   :  { %1003 = shalt.err (!%p1000_p12)
}
  0x3c   :  { %s1004_s16 = scalar_lea.vmem %s1227_s14, 2048  ;;  %p1009_p0 = scmp.lt.s32.totalorder %s1227_s14, %s1227_s14 }
  0x3d   :  { %p1005_p13 = scmp.ne.s32.totalorder %s1227_s14, %s1004_s16  ;;  %p1010_p1 = scmp.lt.s32.totalorder %s1004_s16, %s1004_s16 }
  0x3f   :  { %p1011_p2 = por %p1010_p1, %p1009_p0 }
  0x41   :  { %p1012_p3 = pnand %p1011_p2, %p1005_p13 }
  0x43   :  { %1015 = shalt.err (!%p1012_p3)
}
  0x44   :  { %s1120_s0 = smov 128   ;;  %s1121_s30 = smov 8  }
  0x45   :  { %54 = dma.hbm_to_vmem [thread:$0]  %s1344_s2, 2048, %s1227_s14, [#allocation6], %s1120_s0, %s1120_s0, %s1121_s30  }
  0x46   :  { %s1122_s19 = smov [#allocation10]   ;;  %s1016_s24 = scalar_lea.hbm %s1350_s8, 2048 }
  0x47   :  { %s80_s20 = sshll.u32 %s1122_s19, 4  ;;  %p1017_p4 = scmp.ne.s32.totalorder %s1350_s8, %s1016_s24  ;;  %s81_s20 = int_to_ptr.vmem [resolvable:$true] %s80_s20 }
  0x48   :  { %p1020_p5 = scmp.lt.u32.totalorder %s1016_s24, %s1350_s8 }
  0x4a   :  { %p1022_p6 = pnand %p1020_p5, %p1017_p4 }
  0x4c   :  { %1025 = shalt.err (!%p1022_p6)
}
  0x4d   :  { %s1026_s28 = scalar_lea.vmem %s81_s20, 2048  ;;  %p1031_p8 = scmp.lt.s32.totalorder %s81_s20, %s81_s20 }
  0x4e   :  { %p1027_p7 = scmp.ne.s32.totalorder %s81_s20, %s1026_s28  ;;  %p1032_p9 = scmp.lt.s32.totalorder %s1026_s28, %s1026_s28 }
  0x50   :  { %p1033_p10 = por %p1032_p9, %p1031_p8 }
  0x52   :  { %p1034_p11 = pnand %p1033_p10, %p1027_p7 }
  0x54   :  { %1037 = shalt.err (!%p1034_p11)
}
  0x55   :  { %86 = dma.hbm_to_vmem [thread:$0]  %s1350_s8, 2048, %s81_s20, [#allocation9], %s1116_s1, %s1116_s1, %s1117_s22  }
  0x56   :  { %1104 = dma.done.wait [#allocation3], 128  }
  0x57   :  { %1105 = vsyncadd [#allocation3], 4294967168 }
  0x58   :  { %1106 = dma.done.wait [#allocation6], 2176  }
  0x59   :  { %1107 = vsyncadd [#allocation6], 4294965120 }
  0x5a   :  { %1108 = dma.done.wait [#allocation9], 4096  }
  0x5b   :  { %1109 = vsyncadd [#allocation9], 4294963200  ;;  %v1123_v0 = vmov 0   ;;  %v863_v1 = vld [vmem:[#allocation7 + $0x4] ss:$8 sps:$4 sm:$0xff]   ;;  %v891_v15 = vld [vmem:[#allocation8 + $0x50] sm:$0xff]   ;;  %v125_v35 = vlaneseq }
  0x5c   :  { %247 = vmatprep.mubr.bf16.mxu0 %v1123_v0  ;;  %v865_v2 = vld [vmem:[#allocation7] ss:$8 sps:$4 sm:$0xff]   ;;  %215 = vmatprep.subr.bf16.mxu0 %v863_v1  ;;  %v866_v3 = vld [vmem:[#allocation7 + $0x14] ss:$8 sps:$4 sm:$0xff]   ;;  %v868_v4 = vld [vmem:[#allocation7 + $0x10] ss:$8 sps:$4 sm:$0xff]  }
  0x5d   :  { %216 = vmatpush1.bf16.msra.mxu0 %v865_v2  ;;  %v869_v5 = vld [vmem:[#allocation7 + $0x24] ss:$8 sps:$4 sm:$0xff]   ;;  %v871_v6 = vld [vmem:[#allocation7 + $0x20] ss:$8 sps:$4 sm:$0xff]   ;;  %v872_v7 = vld [vmem:[#allocation7 + $0x34] ss:$8 sps:$4 sm:$0xff]  }
  0x5e   :  { %217 = vmatprep.subr.bf16.mxu0 %v866_v3  ;;  %v874_v8 = vld [vmem:[#allocation7 + $0x30] ss:$8 sps:$4 sm:$0xff]   ;;  %v875_v9 = vld [vmem:[#allocation7 + $0x44] ss:$8 sps:$4 sm:$0xff]   ;;  %v877_v12 = vld [vmem:[#allocation7 + $0x40] ss:$8 sps:$4 sm:$0xff]  }
  0x5f   :  { %v887_v10 = vld [vmem:[#allocation8 + $0x40] sm:$0xff]   ;;  %v889_v13 = vld [vmem:[#allocation8 + $0x48] sm:$0xff]   ;;  %v878_v16 = vld [vmem:[#allocation7 + $0x54] ss:$8 sps:$4 sm:$0xff]   ;;  %v1273_v36 = vshrl.u32 %v125_v35, 7  ;;  %vm435_vm0 = vcmask 130048  }
  0x60   :  { %v888_v11 = vld [vmem:[#allocation8] sm:$0xff]   ;;  %805 = vmatprep.subr.bf16.mxu1 %v887_v10  ;;  %v890_v14 = vld [vmem:[#allocation8 + $0x8] sm:$0xff]   ;;  %v880_v17 = vld [vmem:[#allocation7 + $0x50] ss:$8 sps:$4 sm:$0xff]   ;;  %s1125_s30 = smov [#allocation12]  }
  0x61   :  { %218 = vmatpush1.bf16.msra.mxu0 %v868_v4  ;;  %806 = vmatpush3.bf16.msra.mxu1 %v888_v11  ;;  %v892_v18 = vld [vmem:[#allocation8 + $0x10] sm:$0xff]   ;;  %v893_v19 = vld [vmem:[#allocation8 + $0x58] sm:$0xff]   ;;  %v881_v20 = vld [vmem:[#allocation7 + $0x64] ss:$8 sps:$4 sm:$0xff]   ;;  %v127_v37 = vsub.s32 0, %v1273_v36  ;;  %v131_v39 = vsub.s32 1, %v1273_v36 }
  0x62   :  { %219 = vmatprep.subr.bf16.mxu0 %v869_v5  ;;  %807 = vmatprep.subr.bf16.mxu1 %v889_v13  ;;  %v883_v21 = vld [vmem:[#allocation7 + $0x60] ss:$8 sps:$4 sm:$0xff]   ;;  %v884_v22 = vld [vmem:[#allocation7 + $0x74] ss:$8 sps:$4 sm:$0xff]   ;;  %v886_v26 = vld [vmem:[#allocation7 + $0x70] ss:$8 sps:$4 sm:$0xff]  }
  0x63   :  { %v894_v23 = vld [vmem:[#allocation8 + $0x18] sm:$0xff]   ;;  %v895_v24 = vld [vmem:[#allocation8 + $0x60] sm:$0xff]   ;;  %v105_v27 = vld [vmem:[#allocation2] sm:$0xff] }
  0x64   :  { %v896_v25 = vld [vmem:[#allocation8 + $0x20] sm:$0xff]   ;;  %v897_v28 = vld [vmem:[#allocation8 + $0x68] sm:$0xff]   ;;  %v106_v30 = vpack.c.bf16 %v105_v27, %v105_v27  ;;  %v899_v31 = vld [vmem:[#allocation8 + $0x70] sm:$0xff]  }
  0x65   :  { %220 = vmatpush1.bf16.msra.mxu0 %v871_v6  ;;  %808 = vmatpush3.bf16.msra.mxu1 %v890_v14  ;;  %v898_v29 = vld [vmem:[#allocation8 + $0x28] sm:$0xff]   ;;  %v900_v32 = vld [vmem:[#allocation8 + $0x30] sm:$0xff]   ;;  %v901_v33 = vld [vmem:[#allocation8 + $0x78] sm:$0xff]  }
  0x66   :  { %221 = vmatprep.subr.bf16.mxu0 %v872_v7  ;;  %809 = vmatprep.subr.bf16.mxu1 %v891_v15  ;;  %v902_v34 = vld [vmem:[#allocation8 + $0x38] sm:$0xff]   ;;  %v123_v38 = vld [vmem:[%s1345_s3] sm:$0x3]  ;;  %v905_v53 = vld [vmem:[%s1348_s6 + $0x4] ss:$8 sps:$4 sm:$0xff]  }
  0x67   :  { %v128_v40 = vrot.slane %v123_v38, %v127_v37  ;;  %v132_v41 = vrot.slane %v123_v38, %v131_v39  ;;  %v903_v52 = vld [vmem:[%s1348_s6] ss:$8 sps:$4 sm:$0xff]   ;;  %v910_v3 = vld [vmem:[#allocation10 + $0x50] sm:$0xff]   ;;  %v912_v6 = vld [vmem:[#allocation10 + $0x58] sm:$0xff]  }
  0x68   :  { %v767_v55 = vld [vmem:[%s1347_s5] ss:$0 sm:$0xff]  ;;  %v908_v1 = vld [vmem:[#allocation10 + $0x48] sm:$0xff]   ;;  %s1124_s5 = smov 112   ;;  %v911_v5 = vld [vmem:[#allocation10 + $0x10] sm:$0xff]  }
  0x69   :  { %222 = vmatpush1.bf16.msra.mxu0 %v874_v8  ;;  %810 = vmatpush3.bf16.msra.mxu1 %v892_v18  ;;  %v906_v63 = vld [vmem:[#allocation10 + $0x40] sm:$0xff]   ;;  %v909_v2 = vld [vmem:[#allocation10 + $0x8] sm:$0xff]   ;;  %v913_v7 = vld [vmem:[#allocation10 + $0x18] sm:$0xff]  }
  0x6a   :  { %223 = vmatprep.subr.bf16.mxu0 %v875_v9  ;;  %811 = vmatprep.subr.bf16.mxu1 %v893_v19  ;;  %v914_v8 = vld [vmem:[#allocation10 + $0x60] sm:$0xff]   ;;  %v916_v10 = vld [vmem:[#allocation10 + $0x68] sm:$0xff]   ;;  %v918_v18 = vld [vmem:[#allocation10 + $0x70] sm:$0xff]  }
  0x6b   :  { %v915_v9 = vld [vmem:[#allocation10 + $0x20] sm:$0xff]   ;;  %v917_v11 = vld [vmem:[#allocation10 + $0x28] sm:$0xff]   ;;  %v919_v19 = vld [vmem:[#allocation10 + $0x30] sm:$0xff]  }
  0x6d   :  { %224 = vmatpush1.bf16.msra.mxu0 %v877_v12  ;;  %812 = vmatpush3.bf16.msra.mxu1 %v894_v23  ;;  %v445_v12 = vld [vmem:[#allocation5] sm:$0xff] }
  0x6e   :  { %225 = vmatprep.subr.bf16.mxu0 %v878_v16  ;;  %813 = vmatprep.subr.bf16.mxu1 %v895_v24 }
  0x71   :  { %226 = vmatpush1.bf16.msra.mxu0 %v880_v17  ;;  %814 = vmatpush3.bf16.msra.mxu1 %v896_v25 }
  0x72   :  { %227 = vmatprep.subr.bf16.mxu0 %v881_v20  ;;  %815 = vmatprep.subr.bf16.mxu1 %v897_v28  ;;  %v920_v20 = vld [vmem:[#allocation10 + $0x78] sm:$0xff]  }
  0x75   :  { %228 = vmatpush1.bf16.msra.mxu0 %v883_v21  ;;  %816 = vmatpush3.bf16.msra.mxu1 %v898_v29  ;;  %v921_v21 = vld [vmem:[#allocation10 + $0x38] sm:$0xff]  }
  0x76   :  { %229 = vmatprep.subr.bf16.mxu0 %v884_v22  ;;  %817 = vmatprep.subr.bf16.mxu1 %v899_v31  ;;  %v455_v22 = vld [vmem:[%s1349_s7] sm:$0x3]  ;;  %s723_s7 = sshll.u32 %s1125_s30, 4  ;;  %s724_s7 = int_to_ptr.vmem [resolvable:$true] %s723_s7 }
  0x77   :  { %v460_v23 = vrot.slane %v455_v22, %v127_v37  ;;  %v464_v24 = vrot.slane %v455_v22, %v131_v39  ;;  %s1038_s17 = scalar_lea.vmem %s724_s7, 128  ;;  %p1043_p13 = scmp.lt.s32.totalorder %s724_s7, %s724_s7 }
  0x78   :  { %p1039_p12 = scmp.ne.s32.totalorder %s724_s7, %s1038_s17  ;;  %p1044_p0 = scmp.lt.s32.totalorder %s1038_s17, %s1038_s17 }
  0x79   :  { %230 = vmatpush1.bf16.msra.mxu0 %v886_v26  ;;  %818 = vmatpush3.bf16.msra.mxu1 %v900_v32 }
  0x7a   :  { %819 = vmatprep.subr.bf16.mxu1 %v901_v33  ;;  %480 = vmatprep.subr.bf16.mxu0 %v905_v53  ;;  %p1045_p1 = por %p1044_p0, %p1043_p13 }
  0x7c   :  { %248 = vmatmul.mubr.bf16.vlgmr.msra.gmra.mrb[0].mxu0 %v106_v30  ;;  %p1046_p2 = pnand %p1045_p1, %p1039_p12 }
  0x7d   :  { %512 = vmatprep.mubr.bf16.mxu0 %v1123_v0  ;;  %820 = vmatpush3.bf16.msra.mxu1 %v902_v34  ;;  %v907_v0 = vld [vmem:[#allocation10] sm:$0xff]  }
  0x7e   :  { %481 = vmatpush1.bf16.msra.mxu0 %v903_v52  ;;  %827 = vmatprep.subr.bf16.mxu1 %v906_v63 }
 0x14f   :  { %v249_v42 = vpop.f32.mrb[0].mxu0 }
 0x150   :  { %v250_v43 = vadd.f32 %v249_v42, %v128_v40  ;;  %v251_v44 = vpop.f32.mrb[1].mxu0 }
 0x151   :  { %v252_v45 = vadd.f32 %v251_v44, %v132_v41  ;;  %v253_v46 = vpop.f32.mrb[2].mxu0 }
 0x152   :  { %v256_v47 = vmax.f32 %v250_v43, 0.0  ;;  %v254_v48 = vpop.f32.mrb[3].mxu0 }
 0x153   :  { %v257_v49 = vmax.f32 %v252_v45, 0.0 }
 0x154   :  { %v258_v51 = vpack.c.bf16 %v256_v47, %v256_v47 }
 0x155   :  { %v259_v50 = vpack.c.bf16 %v257_v49, %v257_v49 }
 0x157   :  { %427 = vmatprep.mubr.bf16.mxu1 %v259_v50 }
 0x158   :  { %428 = vmatmul.mubr.bf16.vlgmr.msra.gmra.mrb[0].mxu1 %v258_v51 }
 0x159   :  { %828 = vmatpush3.bf16.msra.mxu1 %v907_v0 }
 0x15a   :  { %829 = vmatprep.subr.bf16.mxu1 %v908_v1 }
 0x15d   :  { %830 = vmatpush3.bf16.msra.mxu1 %v909_v2 }
 0x15e   :  { %831 = vmatprep.subr.bf16.mxu1 %v910_v3 }
 0x161   :  { %832 = vmatpush3.bf16.msra.mxu1 %v911_v5 }
 0x162   :  { %833 = vmatprep.subr.bf16.mxu1 %v912_v6 }
 0x165   :  { %834 = vmatpush3.bf16.msra.mxu1 %v913_v7 }
 0x166   :  { %835 = vmatprep.subr.bf16.mxu1 %v914_v8 }
 0x169   :  { %836 = vmatpush3.bf16.msra.mxu1 %v915_v9 }
 0x16a   :  { %837 = vmatprep.subr.bf16.mxu1 %v916_v10 }
 0x16d   :  { %838 = vmatpush3.bf16.msra.mxu1 %v917_v11 }
 0x16e   :  { %839 = vmatprep.subr.bf16.mxu1 %v918_v18 }
 0x171   :  { %840 = vmatpush3.bf16.msra.mxu1 %v919_v19 }
 0x172   :  { %841 = vmatprep.subr.bf16.mxu1 %v920_v20 }
 0x175   :  { %842 = vmatpush3.bf16.msra.mxu1 %v921_v21 }
 0x22b   :  { %v821_v54 = vpop.f32.mrb[0].mxu1 }
 0x22c   :  { %v822_v56 = vpop.f32.mrb[1].mxu1 }
 0x22d   :  { %v823_v57 = vadd.f32 %v822_v56, %v821_v54  ;;  %v824_v58 = vpop.f32.mrb[2].mxu1 }
 0x22e   :  { %v825_v59 = vpop.f32.mrb[3].mxu1 }
 0x22f   :  { %v430_v60 = vadd.f32 %v823_v57, %v767_v55 }
 0x231   :  { %v442_v61 = vmul.f32 0.5, %v430_v60  ;;  %436 = vst.msk [vmem:[#allocation12] sm:$0xff] %vm435_vm0, %v430_v60 }
 0x233   :  { %v443_v62 = vmul.f32 1.442695, %v442_v61 }
 0x235   :  { %922 = vpow2.f32 %v443_v62 }
 0x23f   :  { %v923_v4 = vpop.eup %922 }
 0x240   :  { %447 = vrot.lane.b32.xlu0 %v923_v4, %s1124_s5 }
 0x244   :  { %438 = vrot.lane.b32.xlu0 %v430_v60, %s1124_s5 }
 0x2b2   :  { %v448_v13 = vpop.permute.xlu0 %447 }
 0x2b3   :  { %v450_v14 = vmul.f32 %v448_v13, %v445_v12 }
 0x2b5   :  { %v451_v15 = vadd.f32 %v450_v14, %v430_v60 }
 0x2b6   :  { %v439_v16 = vpop.permute.xlu0 %438 }
 0x2b7   :  { %v452_v17 = vpack.c.bf16 %v451_v15, %v451_v15  ;;  %441 = vst.msk [vmem:[#allocation14] sm:$0xff] %vm435_vm0, %v439_v16 }
 0x2b9   :  { %786 = vmatmul.mubr.msk.bf16.vlgmr.msra.gmra.mrb[4].mxu0 %vm435_vm0, %v452_v17 }
 0x38c   :  { %v514_v25 = vpop.f32.mrb[4].mxu0 }
 0x38d   :  { %v515_v26 = vadd.f32 %v514_v25, %v460_v23  ;;  %v516_v27 = vpop.f32.mrb[5].mxu0 }
 0x38e   :  { %v517_v28 = vadd.f32 %v516_v27, %v464_v24  ;;  %v518_v29 = vpop.f32.mrb[6].mxu0 }
 0x38f   :  { %v521_v30 = vmax.f32 %v515_v26, 0.0  ;;  %v519_v31 = vpop.f32.mrb[7].mxu0 }
 0x390   :  { %v522_v32 = vmax.f32 %v517_v28, 0.0 }
 0x391   :  { %v523_v34 = vpack.c.bf16 %v521_v30, %v521_v30 }
 0x392   :  { %v524_v33 = vpack.c.bf16 %v522_v32, %v522_v32 }
 0x394   :  { %692 = vmatprep.mubr.bf16.mxu1 %v524_v33 }
 0x395   :  { %693 = vmatmul.mubr.bf16.vlgmr.msra.gmra.mrb[4].mxu1 %v523_v34 }
 0x396   :  { %1049 = shalt.err (!%p1046_p2)
}
 0x397   :  { %s1050_s20 = scalar_lea.hbm %s1353_s11, 128 }
 0x398   :  { %p1051_p3 = scmp.ne.s32.totalorder %s1353_s11, %s1050_s20  ;;  %p1054_p4 = scmp.lt.u32.totalorder %s1050_s20, %s1353_s11 }
 0x39a   :  { %p1056_p5 = pnand %p1054_p4, %p1051_p3 }
 0x39c   :  { %1059 = shalt.err (!%p1056_p5)
}
 0x39d   :  { %726 = dma.vmem_to_hbm [thread:$0]  %s724_s7, 128, %s1353_s11, [#allocation13]  }
 0x39e   :  { %s1126_s27 = smov [#allocation14]  }
 0x39f   :  { %s733_s28 = sshll.u32 %s1126_s27, 4  ;;  %s734_s28 = int_to_ptr.vmem [resolvable:$true] %s733_s28 }
 0x3a0   :  { %s1060_s2 = scalar_lea.vmem %s734_s28, 128  ;;  %p1065_p7 = scmp.lt.s32.totalorder %s734_s28, %s734_s28 }
 0x3a1   :  { %p1061_p6 = scmp.ne.s32.totalorder %s734_s28, %s1060_s2  ;;  %p1066_p8 = scmp.lt.s32.totalorder %s1060_s2, %s1060_s2 }
 0x3a3   :  { %p1067_p9 = por %p1066_p8, %p1065_p7 }
 0x3a5   :  { %p1068_p10 = pnand %p1067_p9, %p1061_p6 }
 0x3a7   :  { %1071 = shalt.err (!%p1068_p10)
}
 0x3a8   :  { %s1072_s1 = scalar_lea.hbm %s1354_s12, 128 }
 0x3a9   :  { %p1073_p11 = scmp.ne.s32.totalorder %s1354_s12, %s1072_s1  ;;  %p1076_p12 = scmp.lt.u32.totalorder %s1072_s1, %s1354_s12 }
 0x3ab   :  { %p1078_p13 = pnand %p1076_p12, %p1073_p11 }
 0x3ad   :  { %1081 = shalt.err (!%p1078_p13)
}
 0x3ae   :  { %736 = dma.vmem_to_hbm [thread:$0]  %s734_s28, 128, %s1354_s12, [#allocation13]   ;;  %v787_v36 = vld [vmem:[%s1351_s9] ss:$0 sm:$0xff] }
 0x3af   :  { %s1127_s6 = smov [#allocation11]  }
 0x3b0   :  { %s713_s0 = sshll.u32 %s1127_s6, 4  ;;  %s714_s0 = int_to_ptr.vmem [resolvable:$true] %s713_s0 }
 0x3b1   :  { %s1082_s12 = scalar_lea.vmem %s714_s0, 128  ;;  %p1087_p1 = scmp.lt.s32.totalorder %s714_s0, %s714_s0 }
 0x3b2   :  { %p1083_p0 = scmp.ne.s32.totalorder %s714_s0, %s1082_s12  ;;  %p1088_p2 = scmp.lt.s32.totalorder %s1082_s12, %s1082_s12 }
 0x3b4   :  { %p1089_p3 = por %p1088_p2, %p1087_p1 }
 0x3b6   :  { %p1090_p4 = pnand %p1089_p3, %p1083_p0 }
 0x468   :  { %v843_v35 = vpop.f32.mrb[4].mxu1 }
 0x469   :  { %v844_v37 = vpop.f32.mrb[5].mxu1 }
 0x46a   :  { %v845_v38 = vadd.f32 %v844_v37, %v843_v35  ;;  %v846_v39 = vpop.f32.mrb[6].mxu1 }
 0x46b   :  { %v847_v40 = vpop.f32.mrb[7].mxu1 }
 0x46c   :  { %v695_v41 = vadd.f32 %v845_v38, %v787_v36 }
 0x46e   :  { %v804_v42 = vmul.f32 -1.442695, %v695_v41 }
 0x470   :  { %924 = vpow2.f32 %v804_v42 }
 0x47a   :  { %v925_v43 = vpop.eup %924 }
 0x47b   :  { %v703_v44 = vadd.f32 1.0, %v925_v43 }
 0x47d   :  { %926 = vrcp.f32 %v703_v44 }
 0x487   :  { %v927_v45 = vpop.eup %926 }
 0x488   :  { %706 = vst [vmem:[#allocation11] sm:$0xff] %v927_v45 }
 0x489   :  { %1093 = shalt.err (!%p1090_p4)
}
 0x48a   :  { %s1094_s7 = scalar_lea.hbm %s1352_s10, 128 }
 0x48b   :  { %p1095_p5 = scmp.ne.s32.totalorder %s1352_s10, %s1094_s7  ;;  %p1098_p6 = scmp.lt.u32.totalorder %s1094_s7, %s1352_s10 }
 0x48d   :  { %p1100_p7 = pnand %p1098_p6, %p1095_p5 }
 0x48f   :  { %1103 = shalt.err (!%p1100_p7)
}
 0x490   :  { %716 = dma.vmem_to_hbm [thread:$0]  %s714_s0, 128, %s1352_s10, [#allocation4]  }
 0x491   :  { %1110 = dma.done.wait [#allocation4], 128  }
 0x492   :  { %1111 = vsyncadd [#allocation4], 4294967168 }
 0x493   :  { %1112 = dma.done.wait [#allocation13], 256  }
 0x494   :  { %1113 = vsyncadd [#allocation13], 4294967040 }
 0x495   :  { %746 = vsyncpa [#allocation3], 1 }
 0x496   :  { %747 = vsyncpa [#allocation6], 1 }
 0x497   :  { %748 = vsyncpa [#allocation9], 1 }
 0x498   :  { %749 = vsyncpa [#allocation4], 1 }
 0x499   :  { %750 = vsyncpa [#allocation13], 1 }

</bundles_post_ra>
